<compile_context>
chip_gen: v7x
topology: tpu7x:2x2x1
jax: 0.10.0
libtpu: 0.0.40
codegen_flags: <defaults>
</compile_context>

<pallas_src>
import functools

import jax
import jax.numpy as jnp
from jax import lax
from jax.experimental import pallas as pl
from jax.experimental.pallas import tpu as pltpu


def _pinn_kernel(xt_ref, w1t_ref, b1t_ref, w2t_ref, b2t_ref, w3_ref, b3_ref,
                 o_ref, *, chunk):
    # xt_ref : (2, TM)   -- row 0 = x, row 1 = t (batch on lanes)
    # w1t_ref: (32, 2)   b1t_ref: (32, 1)
    # w2t_ref: (32, 32)  b2t_ref: (32, 1)
    # w3_ref : (32, 1)   b3_ref : (1, 1)
    # o_ref  : (1, TM)
    tm = o_ref.shape[-1]
    n_chunks = tm // chunk

    # Hoisted parameter loads and bias lane-broadcasts (JAX does not CSE
    # broadcast_in_dim, so doing these inside the loop would re-emit them
    # every iteration).  At chunk=256 the two resident (32, chunk) broadcasts
    # are 16 vregs total -- comfortably inside the 64-vreg file.
    w1t = w1t_ref[...]                                     # (32, 2)
    w1x = w1t[:, 0:1]                                      # (32, 1)
    w1tc = w1t[:, 1:2]                                     # (32, 1)
    b1b = jnp.broadcast_to(b1t_ref[...], (32, chunk))      # (32, chunk)
    w2t = w2t_ref[...]                                     # (32, 32)
    b2b = jnp.broadcast_to(b2t_ref[...], (32, chunk))      # (32, chunk)
    w3 = w3_ref[...]                                       # (32, 1)
    b3 = b3_ref[...]                                       # (1, 1)

    def body(c, carry):
        start = pl.multiple_of(c * chunk, chunk)
        x_row = xt_ref[0:1, pl.ds(start, chunk)]           # (1, chunk)
        t_row = xt_ref[1:2, pl.ds(start, chunk)]           # (1, chunk)

        # Layer 1 (K=2): two VPU FMAs.  (The MXU has huge slack and could take
        # this too, but the binding unit here is the EUP doing tanh, so the
        # exact-f32 VPU form is kept.)
        h = jnp.tanh(w1x * x_row + w1tc * t_row + b1b)     # (32, chunk)

        # Layer 2 (32x32): the only real MXU contraction, kept in f32.
        h = jnp.dot(w2t, h, preferred_element_type=jnp.float32)
        h = jnp.tanh(h + b2b)                              # (32, chunk)

        # Layer 3 (N=1): elementwise multiply + sublane reduce (XLU).
        out = jnp.sum(h * w3, axis=0, keepdims=True) + b3  # (1, chunk)
        o_ref[:, pl.ds(start, chunk)] = out.astype(o_ref.dtype)
        return carry

    lax.fori_loop(0, n_chunks, body, 0, unroll=True)


def pinn_forward_lane_major(xt, params, *, tm=1024, chunk=256):
    """Hot-path entry.

    xt: (2, N_pad) float32, lane-major (row 0 = x, row 1 = t), with
        N_pad a multiple of tm (pad once, outside the training loop --
        collocation points are static for a PINN).
    Returns (1, N_pad) float32 (pad lanes hold garbage; slice in the consumer).
    """
    two, n_pad = xt.shape
    assert two == 2
    chunk = min(chunk, tm)
    assert tm % 128 == 0 and chunk % 128 == 0 and tm % chunk == 0
    assert n_pad % tm == 0, "pre-pad the batch to a multiple of tm"
    n_tiles = n_pad // tm

    # Weights stored as (in_features, out_features); transpose once in the
    # wrapper so the kernel computes h = W^T @ x with activations (32, chunk).
    w1t = params["w1"].T                                   # (32, 2)
    b1t = params["b1"].T                                   # (32, 1)
    w2t = params["w2"].T                                   # (32, 32)
    b2t = params["b2"].T                                   # (32, 1)
    w3 = params["w3"]                                      # (32, 1)
    b3 = params["b3"]                                      # (1, 1)

    def full_spec(a):
        # Constant block index -> fetched once, never refetched per grid step.
        return pl.BlockSpec(a.shape, lambda i: (0,) * a.ndim)

    flops_per_pt = 2 * (2 * 32 + 32 * 32 + 32)             # = 2240
    param_bytes = 4 * (2 * 32 + 32 + 32 * 32 + 32 + 32 + 1)
    cost = pl.CostEstimate(
        flops=flops_per_pt * n_pad,
        transcendentals=64 * n_pad,
        bytes_accessed=4 * (2 * n_pad + n_pad) + param_bytes,
    )

    kernel = functools.partial(_pinn_kernel, chunk=chunk)

    return pl.pallas_call(
        kernel,
        out_shape=jax.ShapeDtypeStruct((1, n_pad), jnp.float32),
        grid_spec=pltpu.PrefetchScalarGridSpec(
            num_scalar_prefetch=0,
            grid=(n_tiles,),
            in_specs=[
                pl.BlockSpec((2, tm), lambda i: (0, i)),    # xt tile, lane-dense
                full_spec(w1t), full_spec(b1t),
                full_spec(w2t), full_spec(b2t),
                full_spec(w3), full_spec(b3),
            ],
            out_specs=pl.BlockSpec((1, tm), lambda i: (0, i)),
        ),
        compiler_params=pltpu.CompilerParams(
            dimension_semantics=("parallel",)),             # 2 TCs on v7x
        cost_estimate=cost,
    )(xt, w1t, b1t, w2t, b2t, w3, b3)


def pinn_forward(x, t, params, *, tm=1024, chunk=256):
    """Drop-in (x, t) wrapper matching the PyTorch forward signature.

    NOTE: the concat/transpose/pad here and the slice/transpose on return are
    separate XLA kernels that add full HBM passes per call.  For the training
    hot path, build the collocation batch once in (2, N_pad) lane-major form
    and call `pinn_forward_lane_major` directly.
    """
    N = x.shape[0]
    xt = jnp.concatenate((x, t), axis=1).T                 # (2, N)
    n_pad = pl.cdiv(N, tm) * tm
    if n_pad != N:
        xt = jnp.pad(xt, ((0, 0), (0, n_pad - N)))         # (2, n_pad)
    out = pinn_forward_lane_major(xt, params, tm=tm, chunk=chunk)
    return out[:, :N].T                                    # (N, 1)


def init_params(key):
    """Deterministic init mimicking PyTorch's default uniform(-1/sqrt(fan_in))."""
    keys = jax.random.split(key, 6)

    def uniform(k, shape, fan_in):
        bound = 1.0 / jnp.sqrt(fan_in)
        return jax.random.uniform(k, shape, jnp.float32, -bound, bound)

    return {
        "w1": uniform(keys[0], (2, 32), 2.0),
        "b1": uniform(keys[1], (1, 32), 2.0),
        "w2": uniform(keys[2], (32, 32), 32.0),
        "b2": uniform(keys[3], (1, 32), 32.0),
        "w3": uniform(keys[4], (32, 1), 32.0),
        "b3": uniform(keys[5], (1, 1), 32.0),
    }


def pinn_forward_ref(x, t, params):
    """Pure-JAX reference for correctness checking."""
    xt = jnp.concatenate((x, t), axis=1)
    h = jnp.tanh(xt @ params["w1"] + params["b1"])
    h = jnp.tanh(h @ params["w2"] + params["b2"])
    return h @ params["w3"] + params["b3"]


if __name__ == "__main__":
    key = jax.random.PRNGKey(0)
    pkey, xkey, tkey = jax.random.split(key, 3)

    params = init_params(pkey)

    # Small collocation batch; deliberately NOT a multiple of the tile size
    # (exercises the pad-and-slice path).
    N = 300
    x_in = jax.random.uniform(xkey, (N, 1), jnp.float32, 0.0, jnp.pi)
    t_in = jax.random.uniform(tkey, (N, 1), jnp.float32, 0.0, jnp.pi)

    ref = pinn_forward_ref(x_in, t_in, params)

    # 1) Drop-in (x, t) API with a small tile so the grid has 2 steps and the
    #    in-kernel chunk loop runs twice per step.
    out = pinn_forward(x_in, t_in, params, tm=256, chunk=128)
    out = jax.block_until_ready(out)
    assert out.shape == (N, 1)
    assert jnp.allclose(out, ref, atol=1e-5, rtol=1e-5), "mismatch (small-tile path)"

    # 2) Hot-path lane-major API at the default (large) tile; pad once up front,
    #    as the training loop would.
    tm_hot = 1024
    n_pad = pl.cdiv(N, tm_hot) * tm_hot
    xt = jnp.concatenate((x_in, t_in), axis=1).T           # (2, N)
    xt = jnp.pad(xt, ((0, 0), (0, n_pad - N)))             # (2, n_pad)
    out2 = jax.block_until_ready(pinn_forward_lane_major(xt, params, tm=tm_hot))
    assert out2.shape == (1, n_pad)
    assert jnp.allclose(out2[:, :N].T, ref, atol=1e-5, rtol=1e-5), "mismatch (hot path)"

    print("KERNEL_OK")
</pallas_src>

<mosaic_0001>
module attributes {stable_mosaic.version = 11 : i64} {
  func.func @_pinn_kernel(%arg0: i32, %arg1: memref<2x256xf32, #tpu.memory_space<vmem>>, %arg2: memref<32x2xf32, #tpu.memory_space<vmem>>, %arg3: memref<32x1xf32, #tpu.memory_space<vmem>>, %arg4: memref<32x32xf32, #tpu.memory_space<vmem>>, %arg5: memref<32x1xf32, #tpu.memory_space<vmem>>, %arg6: memref<32x1xf32, #tpu.memory_space<vmem>>, %arg7: memref<1x1xf32, #tpu.memory_space<vmem>>, %arg8: memref<1x256xf32, #tpu.memory_space<vmem>>) attributes {dimension_semantics = [#tpu.dimension_semantics<parallel>], iteration_bounds = array<i64: 2>, scalar_prefetch = 0 : i64, scratch_operands = 0 : i64, tpu.core_type = #tpu.core_type<tc>, window_params = [{transform_indices = @transform_0, window_bounds = array<i64: 2, 256>}, {pipeline_mode = #tpu.pipeline_mode<synchronous>, transform_indices = @transform_1, window_bounds = array<i64: 32, 2>}, {pipeline_mode = #tpu.pipeline_mode<synchronous>, transform_indices = @transform_2, window_bounds = array<i64: 32, 1>}, {pipeline_mode = #tpu.pipeline_mode<synchronous>, transform_indices = @transform_3, window_bounds = array<i64: 32, 32>}, {pipeline_mode = #tpu.pipeline_mode<synchronous>, transform_indices = @transform_4, window_bounds = array<i64: 32, 1>}, {pipeline_mode = #tpu.pipeline_mode<synchronous>, transform_indices = @transform_5, window_bounds = array<i64: 32, 1>}, {pipeline_mode = #tpu.pipeline_mode<synchronous>, transform_indices = @transform_6, window_bounds = array<i64: 1, 1>}, {transform_indices = @transform_7, window_bounds = array<i64: 1, 256>}]} {
    %c0 = arith.constant 0 : index
    %c0_0 = arith.constant 0 : index
    %0 = vector.load %arg2[%c0, %c0_0] : memref<32x2xf32, #tpu.memory_space<vmem>>, vector<32x2xf32>
    %1 = vector.extract_strided_slice %0 {offsets = [0, 0], sizes = [32, 1], strides = [1, 1]} : vector<32x2xf32> to vector<32x1xf32>
    %2 = vector.extract_strided_slice %0 {offsets = [0, 1], sizes = [32, 1], strides = [1, 1]} : vector<32x2xf32> to vector<32x1xf32>
    %c0_1 = arith.constant 0 : index
    %c0_2 = arith.constant 0 : index
    %3 = vector.load %arg3[%c0_1, %c0_2] : memref<32x1xf32, #tpu.memory_space<vmem>>, vector<32x1xf32>
    %4 = vector.shape_cast %3 : vector<32x1xf32> to vector<32x1xf32>
    %5 = vector.broadcast %4 : vector<32x1xf32> to vector<32x128xf32>
    %c0_3 = arith.constant 0 : index
    %c0_4 = arith.constant 0 : index
    %6 = vector.load %arg4[%c0_3, %c0_4] : memref<32x32xf32, #tpu.memory_space<vmem>>, vector<32x32xf32>
    %c0_5 = arith.constant 0 : index
    %c0_6 = arith.constant 0 : index
    %7 = vector.load %arg5[%c0_5, %c0_6] : memref<32x1xf32, #tpu.memory_space<vmem>>, vector<32x1xf32>
    %8 = vector.shape_cast %7 : vector<32x1xf32> to vector<32x1xf32>
    %9 = vector.broadcast %8 : vector<32x1xf32> to vector<32x128xf32>
    %c0_7 = arith.constant 0 : index
    %c0_8 = arith.constant 0 : index
    %10 = vector.load %arg6[%c0_7, %c0_8] : memref<32x1xf32, #tpu.memory_space<vmem>>, vector<32x1xf32>
    %c0_9 = arith.constant 0 : index
    %c0_10 = arith.constant 0 : index
    %11 = vector.load %arg7[%c0_9, %c0_10] : memref<1x1xf32, #tpu.memory_space<vmem>>, vector<1x1xf32>
    %c0_i32 = arith.constant 0 : i32
    %c128_i32 = arith.constant 128 : i32
    %12 = arith.muli %c0_i32, %c128_i32 : i32
    %13 = tpu.assume_multiple %12, 128 : i32
    %c0_11 = arith.constant 0 : index
    %14 = arith.index_cast %13 : i32 to index
    %15 = vector.load %arg1[%c0_11, %14] : memref<2x256xf32, #tpu.memory_space<vmem>>, vector<1x128xf32>
    %c1 = arith.constant 1 : index
    %16 = arith.index_cast %13 : i32 to index
    %17 = vector.load %arg1[%c1, %16] : memref<2x256xf32, #tpu.memory_space<vmem>>, vector<1x128xf32>
    %18 = vector.broadcast %1 : vector<32x1xf32> to vector<32x128xf32>
    %19 = vector.broadcast %15 : vector<1x128xf32> to vector<32x128xf32>
    %20 = arith.mulf %18, %19 : vector<32x128xf32>
    %21 = vector.broadcast %2 : vector<32x1xf32> to vector<32x128xf32>
    %22 = vector.broadcast %17 : vector<1x128xf32> to vector<32x128xf32>
    %23 = arith.mulf %21, %22 : vector<32x128xf32>
    %24 = arith.addf %20, %23 : vector<32x128xf32>
    %25 = arith.addf %24, %5 : vector<32x128xf32>
    %26 = math.tanh %25 : vector<32x128xf32>
    %cst = arith.constant dense<0.000000e+00> : vector<32x128xf32>
    %27 = tpu.matmul %6, %26, %cst {dimension_numbers = #tpu.dot_dimension_numbers<[1], [0], [0], [1], [0, 0, 1, 1], [], []>} : vector<32x32xf32>, vector<32x128xf32>, vector<32x128xf32> -> vector<32x128xf32>
    %28 = arith.addf %27, %9 : vector<32x128xf32>
    %29 = math.tanh %28 : vector<32x128xf32>
    %30 = vector.broadcast %10 : vector<32x1xf32> to vector<32x128xf32>
    %31 = arith.mulf %29, %30 : vector<32x128xf32>
    %cst_12 = arith.constant dense<0.000000e+00> : vector<128xf32>
    %32 = vector.multi_reduction <add>, %31, %cst_12 [0] : vector<32x128xf32> to vector<128xf32>
    %33 = vector.shape_cast %32 : vector<128xf32> to vector<1x128xf32>
    %34 = vector.broadcast %11 : vector<1x1xf32> to vector<1x128xf32>
    %35 = arith.addf %33, %34 : vector<1x128xf32>
    %c0_13 = arith.constant 0 : index
    %36 = arith.index_cast %13 : i32 to index
    %37 = vector.load %arg8[%c0_13, %36] : memref<1x256xf32, #tpu.memory_space<vmem>>, vector<1x128xf32>
    tpu.vector_store %arg8[%c0_13, %36], %35 {strides = array<i32>} : memref<1x256xf32, #tpu.memory_space<vmem>>, vector<1x128xf32>,
    %c1_i32 = arith.constant 1 : i32
    %c128_i32_14 = arith.constant 128 : i32
    %38 = arith.muli %c1_i32, %c128_i32_14 : i32
    %39 = tpu.assume_multiple %38, 128 : i32
    %c0_15 = arith.constant 0 : index
    %40 = arith.index_cast %39 : i32 to index
    %41 = vector.load %arg1[%c0_15, %40] : memref<2x256xf32, #tpu.memory_space<vmem>>, vector<1x128xf32>
    %c1_16 = arith.constant 1 : index
    %42 = arith.index_cast %39 : i32 to index
    %43 = vector.load %arg1[%c1_16, %42] : memref<2x256xf32, #tpu.memory_space<vmem>>, vector<1x128xf32>
    %44 = vector.broadcast %1 : vector<32x1xf32> to vector<32x128xf32>
    %45 = vector.broadcast %41 : vector<1x128xf32> to vector<32x128xf32>
    %46 = arith.mulf %44, %45 : vector<32x128xf32>
    %47 = vector.broadcast %2 : vector<32x1xf32> to vector<32x128xf32>
    %48 = vector.broadcast %43 : vector<1x128xf32> to vector<32x128xf32>
    %49 = arith.mulf %47, %48 : vector<32x128xf32>
    %50 = arith.addf %46, %49 : vector<32x128xf32>
    %51 = arith.addf %50, %5 : vector<32x128xf32>
    %52 = math.tanh %51 : vector<32x128xf32>
    %cst_17 = arith.constant dense<0.000000e+00> : vector<32x128xf32>
    %53 = tpu.matmul %6, %52, %cst_17 {dimension_numbers = #tpu.dot_dimension_numbers<[1], [0], [0], [1], [0, 0, 1, 1], [], []>} : vector<32x32xf32>, vector<32x128xf32>, vector<32x128xf32> -> vector<32x128xf32>
    %54 = arith.addf %53, %9 : vector<32x128xf32>
    %55 = math.tanh %54 : vector<32x128xf32>
    %56 = vector.broadcast %10 : vector<32x1xf32> to vector<32x128xf32>
    %57 = arith.mulf %55, %56 : vector<32x128xf32>
    %cst_18 = arith.constant dense<0.000000e+00> : vector<128xf32>
    %58 = vector.multi_reduction <add>, %57, %cst_18 [0] : vector<32x128xf32> to vector<128xf32>
    %59 = vector.shape_cast %58 : vector<128xf32> to vector<1x128xf32>
    %60 = vector.broadcast %11 : vector<1x1xf32> to vector<1x128xf32>
    %61 = arith.addf %59, %60 : vector<1x128xf32>
    %c0_19 = arith.constant 0 : index
    %62 = arith.index_cast %39 : i32 to index
    %63 = vector.load %arg8[%c0_19, %62] : memref<1x256xf32, #tpu.memory_space<vmem>>, vector<1x128xf32>
    tpu.vector_store %arg8[%c0_19, %62], %61 {strides = array<i32>} : memref<1x256xf32, #tpu.memory_space<vmem>>, vector<1x128xf32>,
    %c2_i32 = arith.constant 2 : i32
    return
  }
  func.func @transform_0(%arg0: i32) -> (i32, i32) {
    %c0_i32 = arith.constant 0 : i32
    %c0_i32_0 = arith.constant 0 : i32
    return %c0_i32, %arg0 : i32, i32
  }
  func.func @transform_1(%arg0: i32) -> (i32, i32) {
    %c0_i32 = arith.constant 0 : i32
    %c0_i32_0 = arith.constant 0 : i32
    %c0_i32_1 = arith.constant 0 : i32
    return %c0_i32, %c0_i32_0 : i32, i32
  }
  func.func @transform_2(%arg0: i32) -> (i32, i32) {
    %c0_i32 = arith.constant 0 : i32
    %c0_i32_0 = arith.constant 0 : i32
    %c0_i32_1 = arith.constant 0 : i32
    return %c0_i32, %c0_i32_0 : i32, i32
  }
  func.func @transform_3(%arg0: i32) -> (i32, i32) {
    %c0_i32 = arith.constant 0 : i32
    %c0_i32_0 = arith.constant 0 : i32
    %c0_i32_1 = arith.constant 0 : i32
    return %c0_i32, %c0_i32_0 : i32, i32
  }
  func.func @transform_4(%arg0: i32) -> (i32, i32) {
    %c0_i32 = arith.constant 0 : i32
    %c0_i32_0 = arith.constant 0 : i32
    %c0_i32_1 = arith.constant 0 : i32
    return %c0_i32, %c0_i32_0 : i32, i32
  }
  func.func @transform_5(%arg0: i32) -> (i32, i32) {
    %c0_i32 = arith.constant 0 : i32
    %c0_i32_0 = arith.constant 0 : i32
    %c0_i32_1 = arith.constant 0 : i32
    return %c0_i32, %c0_i32_0 : i32, i32
  }
  func.func @transform_6(%arg0: i32) -> (i32, i32) {
    %c0_i32 = arith.constant 0 : i32
    %c0_i32_0 = arith.constant 0 : i32
    %c0_i32_1 = arith.constant 0 : i32
    return %c0_i32, %c0_i32_0 : i32, i32
  }
  func.func @transform_7(%arg0: i32) -> (i32, i32) {
    %c0_i32 = arith.constant 0 : i32
    %c0_i32_0 = arith.constant 0 : i32
    return %c0_i32, %arg0 : i32, i32
  }
}

</mosaic_0001>

<bundles_post_ra>
// kernel: tpu_custom_call.1
= control target key start
LH: loop header
LB: loop body
LE: loop exit
PB: predicated region body
PF: predicated region fallthrough
CT: control target
= control target key end

     0   :  { %s1213_s0 = inlined_call_operand.vmem [shape: f32[2,512], index: 0, kind: input, shape index: {}]   ;;  %s1214_s1 = inlined_call_operand.vmem [shape: f32[32,2], index: 1, kind: input, shape index: {}]   ;;  %s1215_s2 = inlined_call_operand.vmem [shape: f32[32,1], index: 2, kind: input, shape index: {}]   ;;  %s1216_s3 = inlined_call_operand.vmem [shape: f32[32,32], index: 3, kind: input, shape index: {}]   ;;  %s1217_s4 = inlined_call_operand.vmem [shape: f32[32,1], index: 4, kind: input, shape index: {}]   ;;  %s1218_s5 = inlined_call_operand.vmem [shape: f32[32,1], index: 5, kind: input, shape index: {}]   ;;  %s1219_s6 = inlined_call_operand.<no memory space> [shape: f32[1,1], index: 6, kind: input, shape index: {}]   ;;  %s1220_s7 = inlined_call_operand.hbm [shape: f32[1,512], index: 7, kind: output, shape index: {}]  }
   0x1   :  { %v12_v0 = vstv %s1219_s6 }
   0x2   :  { %13 = vst [vmem:[#allocation2] sm:$0x1] %v12_v0 }
   0x3   :  { %14 = vsyncpa [#allocation4], 0 }
   0x4   :  { %16 = vsyncpa [#allocation4 + $0x1], 0  ;;  %s1046_s26 = smov 0   ;;  %s1048_s27 = smov 0  }
   0x5   :  { %s1050_s28 = smov 0   ;;  %s1052_s29 = smov 0  }
   0x6 LB: > { %s1067_s6 = sadd.s32 4294967295, %s998_s29   ;;  %s769_s30 = sadd.s32 4294967294, %s998_s29   ;;  %s998_s29 = sphi %s1052_s29, %s1226_s29   ;;  %s994_s28 = sphi %s1050_s28, %s1225_s28   ;;  %s990_s27 = sphi %s1048_s27, %s1224_s27   ;;  %s986_s26 = sphi %s1046_s26, %s1223_s26  }
   0x7   : > { %s1071_s8 = sadd.s32 1, %s998_s29   ;;  %s181_s9 = sadd.s32 1, %s994_s28 }
   0x8   : > { %s178_s10 = ssub.s32 %s998_s29, %s1071_s8  ;;  %p191_p0 = scmp.ne.s32.totalorder %s994_s28, %s990_s27 }
   0x9   : > { %p179_p1 = scmp.eq.s32.totalorder %s178_s10, 0  ;;  %p192_p2 = scmp.eq.s32.totalorder %s1067_s6, 1 }
   0xa   : > { %p197_p3 = scmp.ne.s32.totalorder %s990_s27, %s986_s26  ;;  %p198_p4 = scmp.eq.s32.totalorder %s769_s30, 1 }
   0xb   : > { %s1082_s11 = scalar_select %p179_p1, %s994_s28, %s181_s9  }
   0xc   : > { %p1084_p5 = por %p192_p2, %p191_p0  ;;  %p1088_p6 = por %p198_p4, %p197_p3 }
   0xd   : > { %p772_p7 = scmp.ge.s32.totalorder %s998_s29, 1  ;;  %p243_p8 = scmp.lt.s32.totalorder %s998_s29, 3 }
   0xf   : > { %p244_p9 = pnand %p772_p7, %p243_p8 }
  0x10   : > { %v284_v1 = vld [vmem:[%s1214_s1 + $0x10] sm:$0xff] (!%p244_p9)  ;;  %v282_v2 = vld [vmem:[%s1214_s1] sm:$0xff] (!%p244_p9)  ;;  %v1000_v3 = vmov (!%p244_p9), 1   ;;  %v283_v4 = vld [vmem:[%s1214_s1 + $0x8] sm:$0xff] (!%p244_p9)  ;;  %v1001_v5 = vmov (!%p244_p9), 0   ;;  %vm409_vm0 = vcmask (!%p244_p9), 261120  }
  0x11   : > { %247 = sbr.rel (%p244_p9) target bundleno = 455 (0x1c7), region = 48  ;;  %900 = vset.pattern.permute.xlu0 (!%p244_p9), %v1000_v3  ;;  %898 = vset.pattern.permute.xlu1 (!%p244_p9), %v1000_v3  ;;  %v287_v6 = vld [vmem:[%s1215_s2 + $0x8] sm:$0xff] (!%p244_p9)  ;;  %v286_v7 = vld [vmem:[%s1215_s2] sm:$0xff] (!%p244_p9)  ;;  %v285_v8 = vld [vmem:[%s1214_s1 + $0x18] sm:$0xff] (!%p244_p9)  ;;  %s774_s18 = sshll.u32 (!%p244_p9), %s1067_s6, 1 }
  0x12   : > { %382 = vperm.xlu0 (!%p244_p9), %900, %v284_v1   ;;  %374 = vperm.xlu1 (!%p244_p9), %898, %v282_v2   ;;  %v289_v9 = vld [vmem:[%s1215_s2 + $0x18] sm:$0xff] (!%p244_p9)  ;;  %v288_v10 = vld [vmem:[%s1215_s2 + $0x10] sm:$0xff] (!%p244_p9)  ;;  %v314_v12 = vld [vmem:[%s1217_s4] sm:$0xff] (!%p244_p9)  ;;  %p276_p10 = scmp.lt.s32.totalorder (!%p244_p9), %s774_s18, 3  ;;  %s272_s14 = sand.u32 (!%p244_p9), 1, %s990_s27  }
  0x13   : > { %v316_v11 = vld [vmem:[%s1217_s4 + $0x10] sm:$0xff] (!%p244_p9)  ;;  %v338_v13 = vld [vmem:[%s1218_s5] sm:$0xff] (!%p244_p9)  ;;  %v315_v14 = vld [vmem:[%s1217_s4 + $0x8] sm:$0xff] (!%p244_p9)  ;;  %s773_s15 = sshll.u32 (!%p244_p9), %s272_s14, 1  ;;  %s796_s16 = sshll.u32 (!%p244_p9), %s1067_s6, 5 }
  0x14   : > { %v340_v15 = vld [vmem:[%s1218_s5 + $0x10] sm:$0xff] (!%p244_p9)  ;;  %v317_v16 = vld [vmem:[%s1217_s4 + $0x18] sm:$0xff] (!%p244_p9)  ;;  %v342_v17 = vld [vmem:[#allocation2] sm:$0x1] (!%p244_p9)  ;;  %s274_s17 = scalar_lea.vmem (!%p244_p9), [#allocation3], %s773_s15  ;;  %s1171_s21 = scalar_lea.hbm (!%p244_p9), %s1220_s7, %s796_s16 }
  0x15   : > { %v339_v18 = vld [vmem:[%s1218_s5 + $0x8] sm:$0xff] (!%p244_p9)  ;;  %v341_v19 = vld [vmem:[%s1218_s5 + $0x18] sm:$0xff] (!%p244_p9)  ;;  %v310_v20 = vld [vmem:[%s1216_s3] sm:$0xff] (!%p244_p9)  ;;  %s1002_s23 = smov (!%p244_p9), [#allocation3]  }
  0x16   : > { %901 = vset.pattern.permute.xlu0 (!%p244_p9), %v1001_v5  ;;  %378 = vperm.xlu1 (!%p244_p9), %898, %v283_v4   ;;  %s940_s24 = sshll.u32 (!%p244_p9), %s1002_s23, 4  ;;  %s941_s24 = int_to_ptr.vmem [resolvable:$false] %s940_s24 }
  0x17   : > { %347 = vperm.xlu0 (!%p244_p9), %901, %v282_v2   ;;  %821 = vmatprep.mubr.msk.f32.mxu0 (!%p244_p9), %vm409_vm0, %v310_v20  ;;  %s942_s25 = scalar_lea.vmem (!%p244_p9), %s941_s24, 64 }
  0x18   : > { %835 = vmatprep.mubr.msk.f32.mxu1 %vm409_vm0, %v310_v20  ;;  %s1228_s18 = smov (!%p276_p10, %s774_s18), 3 }
  0x19   : > { %s775_s19 = sshll.u32 %s1228_s18, 1  ;;  %s710_s18 = sshll.u32 %s274_s17, 4  ;;  %s1173_s18 = int_to_ptr.vmem [resolvable:$true] %s710_s18 }
  0x1a   : > { %899 = vset.pattern.permute.xlu1 %v1001_v5  ;;  %s279_s22 = scalar_lea.vmem %s1213_s0, %s775_s19  ;;  %s936_s6 = scalar_lea.vmem %s1173_s18, 32 }
  0x1b   : > { %352 = vperm.xlu0 %901, %v283_v4   ;;  %297 = vperm.xlu1 %899, %v287_v6   ;;  %v776_v25 = vld [vmem:[%s279_s22] ss:$0 sm:$0xff]  ;;  %v777_v26 = vld [vmem:[%s279_s22 + $0x1] ss:$0 sm:$0xff]  ;;  %v784_v27 = vld [vmem:[%s279_s22 + $0x2] ss:$0 sm:$0xff]  ;;  %p937_p11 = scmp.ne.s32.totalorder %s1173_s18, %s936_s6  ;;  %p943_p0 = scmp.lt.s32.totalorder %s1173_s18, %s941_s24 }
  0x1c   : > { %v785_v28 = vld [vmem:[%s279_s22 + $0x3] ss:$0 sm:$0xff]  ;;  %s696_s22 = scalar_lea.sflag [#allocation4], %s272_s14  ;;  %p944_p1 = scmp.lt.s32.totalorder %s942_s25, %s936_s6 }
  0x1d   : > { %p938_p12 = pnand %p937_p11, %p1084_p5 }
  0x1e   : > { %p945_p2 = por %p944_p1, %p943_p0 }
  0x1f   : > { %292 = vperm.xlu0 %901, %v286_v7   ;;  %362 = vperm.xlu1 %899, %v285_v8   ;;  %p939_p13 = pneg %p938_p12 }
  0x21   : > { %p946_p3 = pnand %p945_p2, %p939_p13 }
  0x23   : > { %357 = vperm.xlu0 %901, %v284_v1   ;;  %902 = vset.pattern.permute.xlu1 %v1000_v3 }
  0x24   : > { %386 = vperm.xlu1 %902, %v285_v8  }
  0x27   : > { %307 = vperm.xlu0 %901, %v289_v9  }
  0x28   : > { %903 = vset.pattern.permute.xlu1 %v1001_v5 }
  0x29   : > { %302 = vperm.xlu1 %903, %v288_v10  }
  0x2b   : > { %330 = vperm.xlu0 %901, %v316_v11  }
  0x2d   : > { %320 = vperm.xlu1 %903, %v314_v12  }
  0x2f   : > { %513 = vperm.xlu0 %901, %v338_v13  }
  0x31   : > { %325 = vperm.xlu1 %903, %v315_v14  }
  0x33   : > { %523 = vperm.xlu0 %901, %v340_v15  }
  0x35   : > { %335 = vperm.xlu1 %903, %v317_v16  }
  0x37   : > { %546 = vperm.xlu0 %901, %v342_v17   ;;  %v311_v17 = vld [vmem:[%s1216_s3 + $0x8] sm:$0xff] }
  0x39   : > { %518 = vperm.xlu1 %903, %v339_v18   ;;  %v312_v18 = vld [vmem:[%s1216_s3 + $0x10] sm:$0xff] }
  0x3d   : > { %528 = vperm.xlu1 %903, %v341_v19   ;;  %v313_v19 = vld [vmem:[%s1216_s3 + $0x18] sm:$0xff] }
  0x91   : > { %v375_v21 = vpop.permute.xlu1 %374  ;;  %v383_v22 = vpop.permute.xlu0 %382 }
  0x92   : > { %v393_v30 = vmul.f32 %v777_v26, %v375_v21  ;;  %v574_v38 = vmul.f32 %v785_v28, %v375_v21  ;;  %v395_v57 = vmul.f32 %v777_v26, %v383_v22  ;;  %v576_v58 = vmul.f32 %v785_v28, %v383_v22 }
  0x95   : > { %v379_v23 = vpop.permute.xlu1 %378 }
  0x96   : > { %v348_v24 = vpop.permute.xlu0 %347  ;;  %v394_v34 = vmul.f32 %v777_v26, %v379_v23  ;;  %v575_v35 = vmul.f32 %v785_v28, %v379_v23 }
  0x97   : > { %v369_v29 = vmul.f32 %v776_v25, %v348_v24  ;;  %v566_v31 = vmul.f32 %v784_v27, %v348_v24 }
  0x99   : > { %v397_v41 = vadd.f32 %v393_v30, %v369_v29  ;;  %v578_v43 = vadd.f32 %v574_v38, %v566_v31 }
  0x9a   : > { %v353_v32 = vpop.permute.xlu0 %352  ;;  %v298_v33 = vpop.permute.xlu1 %297 }
  0x9b   : > { %v370_v36 = vmul.f32 %v776_v25, %v353_v32  ;;  %v567_v37 = vmul.f32 %v784_v27, %v353_v32 }
  0x9d   : > { %v398_v39 = vadd.f32 %v394_v34, %v370_v36  ;;  %v579_v40 = vadd.f32 %v575_v35, %v567_v37 }
  0x9e   : > { %v293_v42 = vpop.permute.xlu0 %292  ;;  %v363_v44 = vpop.permute.xlu1 %362 }
  0x9f   : > { %v402_v45 = vadd.f32 %v398_v39, %v298_v33  ;;  %v583_v46 = vadd.f32 %v579_v40, %v298_v33  ;;  %v401_v47 = vadd.f32 %v397_v41, %v293_v42  ;;  %v582_v48 = vadd.f32 %v578_v43, %v293_v42 }
  0xa0   : > { %v372_v50 = vmul.f32 %v776_v25, %v363_v44  ;;  %v569_v54 = vmul.f32 %v784_v27, %v363_v44 }
  0xa1   : > { %904 = vtanh.f32 %v402_v45 }
  0xa2   : > { %906 = vtanh.f32 %v583_v46  ;;  %v358_v49 = vpop.permute.xlu0 %357 }
  0xa3   : > { %908 = vtanh.f32 %v401_v47  ;;  %v371_v51 = vmul.f32 %v776_v25, %v358_v49  ;;  %v568_v52 = vmul.f32 %v784_v27, %v358_v49  ;;  %v387_v53 = vpop.permute.xlu1 %386 }
  0xa4   : > { %910 = vtanh.f32 %v582_v48  ;;  %v396_v55 = vmul.f32 %v777_v26, %v387_v53  ;;  %v577_v56 = vmul.f32 %v785_v28, %v387_v53 }
  0xa5   : > { %v399_v62 = vadd.f32 %v395_v57, %v371_v51  ;;  %v580_v63 = vadd.f32 %v576_v58, %v568_v52 }
  0xa6   : > { %v308_v59 = vpop.permute.xlu0 %307  ;;  %v400_v60 = vadd.f32 %v396_v55, %v372_v50  ;;  %v581_v61 = vadd.f32 %v577_v56, %v569_v54 }
  0xa8   : > { %v404_v0 = vadd.f32 %v400_v60, %v308_v59  ;;  %v585_v1 = vadd.f32 %v581_v61, %v308_v59  ;;  %v303_v2 = vpop.permute.xlu1 %302 }
  0xa9   : > { %v403_v3 = vadd.f32 %v399_v62, %v303_v2  ;;  %v584_v4 = vadd.f32 %v580_v63, %v303_v2 }
  0xaa   : > { %912 = vtanh.f32 %v404_v0  ;;  %v331_v29 = vpop.permute.xlu0 %330  ;;  %v549_v0 = vlaneseq }
  0xab   : > { %v905_v5 = vpop.eup %904  ;;  %914 = vtanh.f32 %v585_v1 }
  0xac   : > { %v907_v6 = vpop.eup %906  ;;  %916 = vtanh.f32 %v403_v3  ;;  %v321_v20 = vpop.permute.xlu1 %320  ;;  %vm556_vm1 = vcmp.lt.s32.totalorder %v549_v0, 128 }
  0xad   : > { %v909_v7 = vpop.eup %908  ;;  %918 = vtanh.f32 %v584_v4 }
  0xae   : > { %v911_v8 = vpop.eup %910  ;;  %v841_v9 = vpack.c.bf16 %v905_v5, %v909_v7  ;;  %v514_v41 = vpop.permute.xlu0 %513  ;;  %v550_v5 = vshrl.u32 %v549_v0, 7 }
  0xaf   : > { %v849_v10 = vpack.c.bf16 %v907_v6, %v911_v8 }
  0xb0   : > { %842 = vmatprep.subr.bf16.mxu0 %v841_v9  ;;  %v326_v21 = vpop.permute.xlu1 %325 }
  0xb1   : > { %850 = vmatprep.subr.bf16.mxu1 %v849_v10  ;;  %844 = vmatpush3.bf16.msra.mxu0 %v841_v9 }
  0xb2   : > { %852 = vmatpush3.bf16.msra.mxu1 %v849_v10  ;;  %v524_v54 = vpop.permute.xlu0 %523  ;;  %v551_v10 = vsub.s32 0, %v550_v5 }
  0xb4   : > { %v913_v11 = vpop.eup %912  ;;  %v336_v31 = vpop.permute.xlu1 %335 }
  0xb5   : > { %v915_v12 = vpop.eup %914 }
  0xb6   : > { %v917_v13 = vpop.eup %916 }
  0xb7   : > { %v919_v14 = vpop.eup %918  ;;  %v845_v15 = vpack.c.bf16 %v913_v11, %v917_v13 }
  0xb8   : > { %v853_v16 = vpack.c.bf16 %v915_v12, %v919_v14  ;;  %v519_v42 = vpop.permute.xlu1 %518  ;;  %v547_v12 = vpop.permute.xlu0 %546 }
  0xb9   : > { %846 = vmatprep.subr.bf16.mxu0 %v845_v15 }
  0xba   : > { %854 = vmatprep.subr.bf16.mxu1 %v853_v16  ;;  %848 = vmatpush3.bf16.msra.mxu0 %v845_v15 }
  0xbb   : > { %856 = vmatpush3.bf16.msra.mxu1 %v853_v16  ;;  %v552_v16 = vrot.slane %v547_v12, %v551_v10 }
  0xbc   : > { %v529_v58 = vpop.permute.xlu1 %528 }
  0xbd   : > { %822 = vmatmul.mubr.msk.f32.vlgmr.msra.gmra.mrb[0].mxu0 %vm409_vm0, %v311_v17 }
  0xbe   : > { %836 = vmatmul.mubr.msk.f32.vlgmr.msra.gmra.mrb[0].mxu1 %vm409_vm0, %v311_v17  ;;  %824 = vmatprep.mubr.msk.f32.mxu0 %vm409_vm0, %v312_v18 }
  0xbf   : > { %838 = vmatprep.mubr.msk.f32.mxu1 %vm409_vm0, %v312_v18 }
  0xc1   : > { %825 = vmatmul.mubr.msk.f32.gmra.mrb[2].mxu0 %vm409_vm0, %v313_v19 }
  0xc2   : > { %839 = vmatmul.mubr.msk.f32.gmra.mrb[2].mxu1 %vm409_vm0, %v313_v19 }
 0x190   : > { %v823_v22 = vpop.f32.mrb[0].mxu0 }
 0x191   : > { %v494_v23 = vadd.f32 %v823_v22, %v326_v21  ;;  %v837_v24 = vpop.f32.mrb[0].mxu1  ;;  %v488_v25 = vpop.f32.mrb[1].mxu0 }
 0x192   : > { %v662_v26 = vadd.f32 %v837_v24, %v326_v21  ;;  %v489_v27 = vadd.f32 %v488_v25, %v321_v20  ;;  %v656_v28 = vpop.f32.mrb[1].mxu1 }
 0x193   : > { %920 = vtanh.f32 %v494_v23  ;;  %v657_v30 = vadd.f32 %v656_v28, %v321_v20 }
 0x194   : > { %922 = vtanh.f32 %v662_v26  ;;  %v826_v32 = vpop.f32.mrb[2].mxu0 }
 0x195   : > { %924 = vtanh.f32 %v489_v27  ;;  %v504_v33 = vadd.f32 %v826_v32, %v336_v31  ;;  %v840_v34 = vpop.f32.mrb[2].mxu1  ;;  %v498_v35 = vpop.f32.mrb[3].mxu0 }
 0x196   : > { %926 = vtanh.f32 %v657_v30  ;;  %v672_v36 = vadd.f32 %v840_v34, %v336_v31  ;;  %v499_v37 = vadd.f32 %v498_v35, %v331_v29  ;;  %v666_v38 = vpop.f32.mrb[3].mxu1 }
 0x197   : > { %928 = vtanh.f32 %v504_v33  ;;  %v667_v39 = vadd.f32 %v666_v38, %v331_v29 }
 0x198   : > { %930 = vtanh.f32 %v672_v36 }
 0x199   : > { %932 = vtanh.f32 %v499_v37 }
 0x19a   : > { %934 = vtanh.f32 %v667_v39 }
 0x19d   : > { %v921_v40 = vpop.eup %920 }
 0x19e   : > { %v923_v43 = vpop.eup %922  ;;  %v532_v44 = vmul.f32 %v921_v40, %v519_v42 }
 0x19f   : > { %v925_v45 = vpop.eup %924  ;;  %v680_v46 = vmul.f32 %v923_v43, %v519_v42 }
 0x1a0   : > { %v927_v47 = vpop.eup %926  ;;  %v531_v48 = vmul.f32 %v925_v45, %v514_v41 }
 0x1a1   : > { %v929_v49 = vpop.eup %928  ;;  %v679_v50 = vmul.f32 %v927_v47, %v514_v41 }
 0x1a2   : > { %v931_v51 = vpop.eup %930  ;;  %v535_v52 = vadd.f32 %v532_v44, %v531_v48  ;;  %v534_v60 = vmul.f32 %v929_v49, %v529_v58 }
 0x1a3   : > { %v933_v53 = vpop.eup %932  ;;  %v683_v55 = vadd.f32 %v680_v46, %v679_v50  ;;  %v682_v62 = vmul.f32 %v931_v51, %v529_v58 }
 0x1a4   : > { %v935_v56 = vpop.eup %934  ;;  %v533_v57 = vmul.f32 %v933_v53, %v524_v54 }
 0x1a5   : > { %v681_v59 = vmul.f32 %v935_v56, %v524_v54 }
 0x1a6   : > { %v536_v61 = vadd.f32 %v535_v52, %v533_v57 }
 0x1a7   : > { %v684_v63 = vadd.f32 %v683_v55, %v681_v59 }
 0x1a8   : > { %v537_v1 = vadd.f32 %v536_v61, %v534_v60 }
 0x1a9   : > { %v685_v2 = vadd.f32 %v684_v63, %v682_v62 }
 0x1aa   : > { %v538_v3 = vrot.slane %v537_v1, 4 }
 0x1ab   : > { %v686_v4 = vrot.slane %v685_v2, 4 }
 0x1ac   : > { %v539_v6 = vadd.f32 %v538_v3, %v537_v1 }
 0x1ad   : > { %v687_v7 = vadd.f32 %v686_v4, %v685_v2 }
 0x1ae   : > { %v540_v8 = vrot.slane %v539_v6, 2 }
 0x1af   : > { %v688_v9 = vrot.slane %v687_v7, 2 }
 0x1b0   : > { %v541_v11 = vadd.f32 %v540_v8, %v539_v6 }
 0x1b1   : > { %v689_v13 = vadd.f32 %v688_v9, %v687_v7 }
 0x1b2   : > { %v542_v14 = vrot.slane %v541_v11, 1 }
 0x1b3   : > { %v690_v15 = vrot.slane %v689_v13, 1 }
 0x1b4   : > { %v543_v17 = vadd.f32 %v542_v14, %v541_v11 }
 0x1b5   : > { %v691_v18 = vadd.f32 %v690_v15, %v689_v13 }
 0x1b6   : > { %v553_v19 = vadd.f32 %v552_v16, %v543_v17 }
 0x1b7   : > { %v692_v20 = vadd.f32 %v691_v18, %v552_v16 }
 0x1b8   : > { %558 = vst.msk [vmem:[%s274_s17] sm:$0x1] %vm556_vm1, %v553_v19 }
 0x1b9   : > { %790 = vst.msk [vmem:[%s274_s17 + $0x1] sm:$0x1] %vm556_vm1, %v692_v20 }
 0x1ba   : > { %949 = shalt.err (!%p946_p3)
}
 0x1bb   : > { %s950_s30 = scalar_lea.hbm %s1171_s21, 32  ;;  %s954_s14 = scalar_lea.hbm %s1220_s7, 64 }
 0x1bc   : > { %p951_p4 = scmp.ne.s32.totalorder %s1171_s21, %s950_s30  ;;  %p955_p9 = scmp.lt.u32.totalorder %s1171_s21, %s1220_s7 }
 0x1bd   : > { %p956_p10 = scmp.lt.u32.totalorder %s954_s14, %s950_s30  ;;  %p958_p12 = scmp.lt.u32.totalorder %s950_s30, %s1171_s21 }
 0x1be   : > { %p952_p7 = pnand %p951_p4, %p1084_p5 }
 0x1bf   : > { %p957_p11 = por %p956_p10, %p955_p9 }
 0x1c0   : > { %p953_p8 = pneg %p952_p7 }
 0x1c1   : > { %p959_p13 = por %p958_p12, %p957_p11 }
 0x1c3   : > { %p960_p0 = pnand %p959_p13, %p953_p8 }
 0x1c5   : > { %963 = shalt.err (!%p960_p0)
}
 0x1c6   : > { %857 = dma.vmem_to_hbm [thread:$0]  (%p1084_p5), %s1173_s18, 32, %s1171_s21, %s696_s22  }
 0x1c7 PF: > { %p863_p1 = scmp.ge.s32.totalorder %s998_s29, 2  ;;  %s722_s17 = sand.u32 1, %s986_s26  }
 0x1c8   : > { %s723_s19 = scalar_lea.sflag [#allocation4], %s722_s17 }
 0x1c9   : > { %p860_p2 = pnand %p863_p1, %p1088_p6 }
 0x1cb   : > { %981 = dma.done.wait (!%p860_p2), %s723_s19, 32  }
 0x1cc   : > { %983 = vsyncadd (!%p860_p2), %s723_s19, 4294967264  ;;  %p19_p3 = scmp.ge.s32.totalorder %s1071_s8, 4   ;;  %s1223_s26 = smov %s990_s27 }
 0x1cd   : > { %s1224_s27 = smov %s994_s28  ;;  %s1225_s28 = smov %s1082_s11 }
 0x1ce   : > { %s1226_s29 = smov %s1071_s8  ;;  %21 = sbr.rel (!%p19_p3) target bundleno = 6 (0x6), region = 85 }
 0x1d5   :  { %728 = vsyncpa [#allocation4], 1 }
 0x1d6   :  { %730 = vsyncpa [#allocation4 + $0x1], 1 }

</bundles_post_ra>
